<compile_context>
chip_gen: v5e
topology: v5e:2x2
jax: 0.10.0
libtpu: 0.0.40
codegen_flags: <defaults>
</compile_context>

<pallas_src>
import functools

import jax
import jax.numpy as jnp
from jax.experimental import pallas as pl
from jax.experimental.pallas import tpu as pltpu

M_POS = 0.9
M_NEG = 0.1
LAMB = 0.5
RECON_SCALE = 0.0005
NUM_CLASSES = 10

_DEFAULT_TILE_ROWS = 2048                   # rows per tile cap (general path)
_TILE_BYTES_BUDGET = 8 * 1024 * 1024        # per input tile buffer (general path)
_FAST_PATH_BYTES = 4 * 1024 * 1024          # per operand: single-block fast path
_VMEM_LIMIT_BYTES = 48 * 1024 * 1024        # fits v5e/v6e (128 MiB) and v7x (64 MiB)
_WIDTH_CANDIDATES = (1024, 512, 256, 128)   # lane-dense flat widths (128-multiples)


def _round_up(v, m):
    return ((v + m - 1) // m) * m


def _num_tensorcores():
    """Best-effort TensorCore-per-device count (2 only for megacore chips)."""
    try:
        info = pltpu.get_tpu_info()
        for attr in ("num_cores", "core_count", "num_tensorcores", "tensorcore_count"):
            v = getattr(info, attr, None)
            if isinstance(v, int) and v > 0:
                return max(1, min(int(v), 2))
    except Exception:
        pass
    try:
        kind = jax.devices()[0].device_kind.lower()
        if "v4" in kind or "v7" in kind or "tpu7" in kind or "7x" in kind:
            return 2          # megacore: 2 TensorCores per device
    except Exception:
        pass
    return 1                  # v5e / v6e: 1 TensorCore per chip


def _pick_width(n):
    """Pick a lane-dense flat width. Returns (width, needs_flat_tail_pad)."""
    best = None
    for w in _WIDTH_CANDIDATES:             # largest first
        if n % w == 0:
            r = n // w
            if r >= 8 and r % 8 == 0:
                return w, False             # ideal: no padding anywhere
            if best is None:
                best = w                    # divides N, rows may need tiny pad
    if best is not None:
        return best, False
    return 128, True                        # rare: pad the flat tail once


def _largest_divisor_tile(per, cap):
    """Largest multiple-of-8 tile <= cap that exactly divides `per` (multiple of 8)."""
    t = min(cap, per)
    t -= t % 8
    while t >= 8:
        if per % t == 0:
            return t
        t -= 8
    return None


def _plan_grid(rows, nsplit, row_cap):
    """Return (nsplit, tile_rows, steps, padded_rows).  `rows` is a multiple of 8."""
    nsplit = max(1, min(nsplit, rows // 8))
    # Prefer a plan that needs no row padding (padding copies the whole operand).
    for ns in range(nsplit, 0, -1):
        if rows % (ns * 8) != 0:
            continue
        per = rows // ns
        tr = _largest_divisor_tile(per, row_cap)
        if tr is not None and (tr >= 128 or tr == per):
            return ns, tr, per // tr, rows
    # Padded fallback (only for awkward row counts).
    tr = min(row_cap, _round_up(pl.cdiv(rows, nsplit), 8))
    tr = max(8, (tr // 8) * 8)
    steps = pl.cdiv(rows, nsplit * tr)
    return nsplit, tr, steps, nsplit * steps * tr


def _capsule_loss_kernel(score_ref, y_ref, x_ref, xr_ref, out_ref, acc_ref, *, inv_b):
    i = pl.program_id(1)                    # row-tile step (reduction axis, last)
    last = pl.num_programs(1) - 1

    # ---- init per-split vector accumulator --------------------------------
    @pl.when(i == 0)
    def _init():
        acc_ref[...] = jnp.zeros_like(acc_ref)

    # ---- streaming squared-error partials (VPU only on the carried path) --
    d = x_ref[...].astype(jnp.float32) - xr_ref[...].astype(jnp.float32)
    d2 = d * d
    tr, w = d2.shape
    # (tr, w) -> (tr//8, 8, w) is a tile-aligned regroup; sum over the leading
    # axis is plain vreg adds (no cross-lane reduce, no SMEM scalar round-trip).
    acc_ref[...] += jnp.sum(d2.reshape(tr // 8, 8, w), axis=0)

    # ---- finalize: single cross-lane reduce + margin, one lane-dense write --
    @pl.when(i == last)
    def _finalize():
        recon_partial = jnp.sum(acc_ref[...])                 # one XLU reduce / split

        score = score_ref[...].astype(jnp.float32)            # (B, 10), resident
        labels = y_ref[...]                                    # (B, 1) int32, resident
        cls = jax.lax.broadcasted_iota(jnp.int32, score.shape, 1)
        tc = (cls == labels).astype(jnp.float32)               # one-hot (B, 10)
        loss_pos = jnp.square(jnp.maximum(M_POS - score, 0.0))
        loss_neg = jnp.square(jnp.maximum(score - M_NEG, 0.0))
        margin = jnp.sum(tc * loss_pos + LAMB * (1.0 - tc) * loss_neg) * inv_b

        row = jax.lax.broadcasted_iota(jnp.int32, out_ref.shape, 1)   # (1, 8, 128)
        out_ref[...] = jnp.where(row == 0, recon_partial,
                                 jnp.where(row == 1, margin, 0.0))


def capsule_loss(x, y, x_reconstruction, y_pred, *,
                 tile_rows=_DEFAULT_TILE_ROWS, nsplit=None,
                 reconstruction_loss_scale=RECON_SCALE,
                 max_single_block_bytes=_FAST_PATH_BYTES):
    """Returns (loss, margin_loss, reconstruction_loss) — same as Capsule_Loss."""
    B, C, H, W = x.shape
    assert x_reconstruction.shape == x.shape
    n = B * C * H * W
    itemsize = jnp.dtype(x.dtype).itemsize

    # ---- lane-dense flatten (native dtype; kernel upcasts to f32) ----------
    w_flat, need_flat_pad = _pick_width(n)
    xf = x.reshape(-1)
    xrf = x_reconstruction.reshape(-1)
    if need_flat_pad:
        padded_n = _round_up(n, w_flat * 8)
        xf = jnp.pad(xf, (0, padded_n - n))
        xrf = jnp.pad(xrf, (0, padded_n - n))
    else:
        padded_n = n
    rows = padded_n // w_flat
    x2 = xf.reshape(rows, w_flat)
    xr2 = xrf.reshape(rows, w_flat)
    if rows % 8:                                   # rare, tiny copy
        pad_r = _round_up(rows, 8) - rows
        x2 = jnp.pad(x2, ((0, pad_r), (0, 0)))
        xr2 = jnp.pad(xr2, ((0, pad_r), (0, 0)))
        rows += pad_r

    y2 = y.reshape(B, 1).astype(jnp.int32)
    score = y_pred

    if nsplit is None:
        nsplit = _num_tensorcores()

    # ---- grid planning ------------------------------------------------------
    operand_bytes = rows * w_flat * itemsize
    if operand_bytes <= max_single_block_bytes:
        # Small-problem fast path: one block, one DMA, one reduce.
        nsplit, tr, steps = 1, rows, 1
    else:
        row_cap = min(tile_rows,
                      max(8, (_TILE_BYTES_BUDGET // (w_flat * itemsize)) // 8 * 8))
        row_cap = max(8, (row_cap // 8) * 8)
        nsplit, tr, steps, padded_rows = _plan_grid(rows, nsplit, row_cap)
        if padded_rows != rows:
            pad_r = padded_rows - rows
            x2 = jnp.pad(x2, ((0, pad_r), (0, 0)))
            xr2 = jnp.pad(xr2, ((0, pad_r), (0, 0)))
            rows = padded_rows

    kernel = functools.partial(_capsule_loss_kernel, inv_b=1.0 / B)

    out_bytes = nsplit * 8 * 128 * 4
    cost = pl.CostEstimate(
        flops=3 * rows * w_flat + nsplit * 8 * B * NUM_CLASSES,
        transcendentals=0,
        bytes_accessed=(2 * rows * w_flat * itemsize
                        + B * NUM_CLASSES * jnp.dtype(score.dtype).itemsize
                        + 4 * B + out_bytes))

    parts = pl.pallas_call(
        kernel,
        out_shape=jax.ShapeDtypeStruct((nsplit, 8, 128), jnp.float32),
        grid=(nsplit, steps),
        in_specs=[
            pl.BlockSpec((B, NUM_CLASSES), lambda s, i: (0, 0)),        # score (resident)
            pl.BlockSpec((B, 1), lambda s, i: (0, 0)),                  # labels (resident)
            pl.BlockSpec((tr, w_flat), lambda s, i: (s * steps + i, 0)),  # x
            pl.BlockSpec((tr, w_flat), lambda s, i: (s * steps + i, 0)),  # x_rec
        ],
        out_specs=pl.BlockSpec((1, 8, 128), lambda s, i: (s, 0, 0)),
        scratch_shapes=[pltpu.VMEM((8, w_flat), jnp.float32)],
        compiler_params=pltpu.CompilerParams(
            dimension_semantics=("parallel", "arbitrary"),
            vmem_limit_bytes=_VMEM_LIMIT_BYTES),
        cost_estimate=cost,
    )(score, y2, x2, xr2)

    # Tiny final combine (a handful of scalar ops).
    margin = parts[0, 1, 0]
    recon = reconstruction_loss_scale * (jnp.sum(parts[:, 0, 0]) / (B * C))
    loss = margin + recon
    return loss, margin, recon


def _reference(x, y, x_reconstruction, y_pred):
    yp = y_pred.astype(jnp.float32)
    tc = jax.nn.one_hot(y, NUM_CLASSES, dtype=jnp.float32)
    lp = jnp.square(jnp.maximum(M_POS - yp, 0.0))
    ln = jnp.square(jnp.maximum(yp - M_NEG, 0.0))
    margin = jnp.mean(jnp.sum(tc * lp + LAMB * (1.0 - tc) * ln, axis=-1))
    diff = x.astype(jnp.float32) - x_reconstruction.astype(jnp.float32)
    recon = RECON_SCALE * jnp.mean(jnp.sum(jnp.square(diff), axis=(-2, -1)))
    return margin + recon, margin, recon


if __name__ == "__main__":
    key = jax.random.PRNGKey(0)
    k1, k2, k3, k4 = jax.random.split(key, 4)

    def _check(out, ref):
        for a, b in zip(out, ref):
            assert jnp.allclose(a, b, rtol=1e-5, atol=1e-5), (a, b)

    # Case 1: small shapes — single-block fast path, auto lane-dense width.
    B, C, H, W = 2, 4, 16, 16
    x = jax.random.uniform(k1, (B, C, H, W), dtype=jnp.float32)
    x_rec = jax.random.uniform(k2, (B, C, H, W), dtype=jnp.float32)
    y_pred = jax.random.uniform(k3, (B, NUM_CLASSES), dtype=jnp.float32)
    y = jax.random.randint(k4, (B,), 0, NUM_CLASSES, dtype=jnp.int32)
    out = capsule_loss(x, y, x_rec, y_pred)
    jax.block_until_ready(out)
    _check(out, _reference(x, y, x_rec, y_pred))

    # Case 2: force the streaming general path (multi-step reduction, nsplit=1).
    B2, C2 = 8, 8
    xb = jax.random.uniform(k1, (B2, C2, H, W), dtype=jnp.float32)
    xrb = jax.random.uniform(k2, (B2, C2, H, W), dtype=jnp.float32)
    ypb = jax.random.uniform(k3, (B2, NUM_CLASSES), dtype=jnp.float32)
    yb = jax.random.randint(k4, (B2,), 0, NUM_CLASSES, dtype=jnp.int32)
    out2 = capsule_loss(xb, yb, xrb, ypb, tile_rows=8, nsplit=1,
                        max_single_block_bytes=0)
    jax.block_until_ready(out2)
    _check(out2, _reference(xb, yb, xrb, ypb))

    # Case 3: forced 2-way "parallel" split (exercises the multi-split combine).
    out3 = capsule_loss(xb, yb, xrb, ypb, tile_rows=8, nsplit=2,
                        max_single_block_bytes=0)
    jax.block_until_ready(out3)
    _check(out3, _reference(xb, yb, xrb, ypb))

    # Case 4: element count not divisible by 128 (flat-tail zero-padding path).
    B3, C3, H3, W3 = 2, 3, 15, 15
    xo = jax.random.uniform(k1, (B3, C3, H3, W3), dtype=jnp.float32)
    xro = jax.random.uniform(k2, (B3, C3, H3, W3), dtype=jnp.float32)
    ypo = jax.random.uniform(k3, (B3, NUM_CLASSES), dtype=jnp.float32)
    yo = jax.random.randint(k4, (B3,), 0, NUM_CLASSES, dtype=jnp.int32)
    out4 = capsule_loss(xo, yo, xro, ypo)
    jax.block_until_ready(out4)
    _check(out4, _reference(xo, yo, xro, ypo))

    print("KERNEL_OK")
</pallas_src>

<mosaic_0001>
module attributes {stable_mosaic.version = 11 : i64} {
  func.func @_capsule_loss_kernel(%arg0: i32, %arg1: i32, %arg2: memref<2x10xf32, #tpu.memory_space<vmem>>, %arg3: memref<2x1xi32, #tpu.memory_space<vmem>>, %arg4: memref<8x256xf32, #tpu.memory_space<vmem>>, %arg5: memref<8x256xf32, #tpu.memory_space<vmem>>, %arg6: memref<1x8x128xf32, #tpu.memory_space<vmem>>, %arg7: memref<8x256xf32, #tpu.memory_space<vmem>>) attributes {dimension_semantics = [#tpu.dimension_semantics<parallel>, #tpu.dimension_semantics<arbitrary>], iteration_bounds = array<i64: 1, 1>, scalar_prefetch = 0 : i64, scratch_operands = 1 : i64, tpu.core_type = #tpu.core_type<tc>, window_params = [{pipeline_mode = #tpu.pipeline_mode<synchronous>, transform_indices = @transform_0, window_bounds = array<i64: 2, 10>}, {pipeline_mode = #tpu.pipeline_mode<synchronous>, transform_indices = @transform_1, window_bounds = array<i64: 2, 1>}, {transform_indices = @transform_2, window_bounds = array<i64: 8, 256>}, {transform_indices = @transform_3, window_bounds = array<i64: 8, 256>}, {transform_indices = @transform_4, window_bounds = array<i64: 1, 8, 128>}]} {
    %c0_i32 = arith.constant 0 : i32
    %0 = arith.cmpi eq, %arg1, %c0_i32 : i32
    %1 = arith.extui %0 : i1 to i32
    %c0_i32_0 = arith.constant 0 : i32
    %2 = arith.cmpi ne, %1, %c0_i32_0 : i32
    scf.if %2 {
      %cst_10 = arith.constant 0.000000e+00 : f32
      %15 = vector.broadcast %cst_10 : f32 to vector<8x256xf32>
      %c0_11 = arith.constant 0 : index
      %c0_12 = arith.constant 0 : index
      %16 = vector.load %arg7[%c0_11, %c0_12] : memref<8x256xf32, #tpu.memory_space<vmem>>, vector<8x256xf32>
      tpu.vector_store %arg7[%c0_11, %c0_12], %15 {strides = array<i32>} : memref<8x256xf32, #tpu.memory_space<vmem>>, vector<8x256xf32>,
    } else {
    }
    %c0 = arith.constant 0 : index
    %c0_1 = arith.constant 0 : index
    %3 = vector.load %arg4[%c0, %c0_1] : memref<8x256xf32, #tpu.memory_space<vmem>>, vector<8x256xf32>
    %c0_2 = arith.constant 0 : index
    %c0_3 = arith.constant 0 : index
    %4 = vector.load %arg5[%c0_2, %c0_3] : memref<8x256xf32, #tpu.memory_space<vmem>>, vector<8x256xf32>
    %5 = arith.subf %3, %4 : vector<8x256xf32>
    %6 = arith.mulf %5, %5 : vector<8x256xf32>
    %c0_4 = arith.constant 0 : index
    %c0_5 = arith.constant 0 : index
    %7 = vector.load %arg7[%c0_4, %c0_5] : memref<8x256xf32, #tpu.memory_space<vmem>>, vector<8x256xf32>
    %8 = vector.shape_cast %6 : vector<8x256xf32> to vector<1x8x256xf32>
    %cst = arith.constant dense<0.000000e+00> : vector<8x256xf32>
    %9 = vector.multi_reduction <add>, %8, %cst [0] : vector<1x8x256xf32> to vector<8x256xf32>
    %10 = arith.addf %7, %9 : vector<8x256xf32>
    %c0_6 = arith.constant 0 : index
    %c0_7 = arith.constant 0 : index
    %11 = vector.load %arg7[%c0_6, %c0_7] : memref<8x256xf32, #tpu.memory_space<vmem>>, vector<8x256xf32>
    tpu.vector_store %arg7[%c0_6, %c0_7], %10 {strides = array<i32>} : memref<8x256xf32, #tpu.memory_space<vmem>>, vector<8x256xf32>,
    %c0_i32_8 = arith.constant 0 : i32
    %12 = arith.cmpi eq, %arg1, %c0_i32_8 : i32
    %13 = arith.extui %12 : i1 to i32
    %c0_i32_9 = arith.constant 0 : i32
    %14 = arith.cmpi ne, %13, %c0_i32_9 : i32
    scf.if %14 {
      %c0_10 = arith.constant 0 : index
      %c0_11 = arith.constant 0 : index
      %15 = vector.load %arg7[%c0_10, %c0_11] : memref<8x256xf32, #tpu.memory_space<vmem>>, vector<8x256xf32>
      %16 = vector.shape_cast %15 : vector<8x256xf32> to vector<1x8x256xf32>
      %cst_12 = arith.constant dense<0.000000e+00> : vector<1xf32>
      %17 = vector.multi_reduction <add>, %16, %cst_12 [1, 2] : vector<1x8x256xf32> to vector<1xf32>
      %18 = vector.shape_cast %17 : vector<1xf32> to vector<1x1x1xf32>
      %19 = vector.extract %18[0, 0, 0] : f32 from vector<1x1x1xf32>
      %c0_13 = arith.constant 0 : index
      %c0_14 = arith.constant 0 : index
      %20 = vector.load %arg2[%c0_13, %c0_14] : memref<2x10xf32, #tpu.memory_space<vmem>>, vector<2x10xf32>
      %c0_15 = arith.constant 0 : index
      %c0_16 = arith.constant 0 : index
      %21 = vector.load %arg3[%c0_15, %c0_16] : memref<2x1xi32, #tpu.memory_space<vmem>>, vector<2x1xi32>
      %22 = tpu.iota {dimensions = array<i32: 1>} : vector<2x10xi32>
      %23 = vector.broadcast %21 : vector<2x1xi32> to vector<2x10xi32>
      %24 = arith.cmpi eq, %22, %23 : vector<2x10xi32>
      %25 = arith.extui %24 : vector<2x10xi1> to vector<2x10xi32>
      %26 = arith.sitofp %25 : vector<2x10xi32> to vector<2x10xf32>
      %cst_17 = arith.constant 0.899999976 : f32
      %27 = vector.broadcast %cst_17 : f32 to vector<2x10xf32>
      %28 = arith.subf %27, %20 : vector<2x10xf32>
      %cst_18 = arith.constant 0.000000e+00 : f32
      %29 = vector.broadcast %cst_18 : f32 to vector<2x10xf32>
      %30 = arith.maximumf %28, %29 : vector<2x10xf32>
      %31 = arith.mulf %30, %30 : vector<2x10xf32>
      %cst_19 = arith.constant 1.000000e-01 : f32
      %32 = vector.broadcast %cst_19 : f32 to vector<2x10xf32>
      %33 = arith.subf %20, %32 : vector<2x10xf32>
      %cst_20 = arith.constant 0.000000e+00 : f32
      %34 = vector.broadcast %cst_20 : f32 to vector<2x10xf32>
      %35 = arith.maximumf %33, %34 : vector<2x10xf32>
      %36 = arith.mulf %35, %35 : vector<2x10xf32>
      %37 = arith.mulf %26, %31 : vector<2x10xf32>
      %cst_21 = arith.constant 1.000000e+00 : f32
      %38 = vector.broadcast %cst_21 : f32 to vector<2x10xf32>
      %39 = arith.subf %38, %26 : vector<2x10xf32>
      %cst_22 = arith.constant 5.000000e-01 : f32
      %40 = vector.broadcast %cst_22 : f32 to vector<2x10xf32>
      %41 = arith.mulf %40, %39 : vector<2x10xf32>
      %42 = arith.mulf %41, %36 : vector<2x10xf32>
      %43 = arith.addf %37, %42 : vector<2x10xf32>
      %44 = vector.shape_cast %43 : vector<2x10xf32> to vector<1x2x10xf32>
      %cst_23 = arith.constant dense<0.000000e+00> : vector<1xf32>
      %45 = vector.multi_reduction <add>, %44, %cst_23 [1, 2] : vector<1x2x10xf32> to vector<1xf32>
      %46 = vector.shape_cast %45 : vector<1xf32> to vector<1x1x1xf32>
      %47 = vector.extract %46[0, 0, 0] : f32 from vector<1x1x1xf32>
      %cst_24 = arith.constant 5.000000e-01 : f32
      %48 = arith.mulf %47, %cst_24 : f32
      %49 = tpu.iota {dimensions = array<i32: 1>} : vector<1x8x128xi32>
      %c0_i32_25 = arith.constant 0 : i32
      %50 = vector.broadcast %c0_i32_25 : i32 to vector<1x8x128xi32>
      %51 = arith.cmpi eq, %49, %50 : vector<1x8x128xi32>
      %c1_i32 = arith.constant 1 : i32
      %52 = vector.broadcast %c1_i32 : i32 to vector<1x8x128xi32>
      %53 = arith.cmpi eq, %49, %52 : vector<1x8x128xi32>
      %cst_26 = arith.constant 0.000000e+00 : f32
      %54 = vector.broadcast %48 : f32 to vector<1x8x128xf32>
      %55 = vector.broadcast %cst_26 : f32 to vector<1x8x128xf32>
      %56 = arith.select %53, %54, %55 : vector<1x8x128xi1>, vector<1x8x128xf32>
      %57 = vector.broadcast %19 : f32 to vector<1x8x128xf32>
      %58 = arith.select %51, %57, %56 : vector<1x8x128xi1>, vector<1x8x128xf32>
      %c0_27 = arith.constant 0 : index
      %c0_28 = arith.constant 0 : index
      %c0_29 = arith.constant 0 : index
      %59 = vector.load %arg6[%c0_27, %c0_28, %c0_29] : memref<1x8x128xf32, #tpu.memory_space<vmem>>, vector<1x8x128xf32>
      tpu.vector_store %arg6[%c0_27, %c0_28, %c0_29], %58 {strides = array<i32>} : memref<1x8x128xf32, #tpu.memory_space<vmem>>, vector<1x8x128xf32>,
    } else {
    }
    return
  }
  func.func @transform_0(%arg0: i32, %arg1: i32) -> (i32, i32) {
    %c0_i32 = arith.constant 0 : i32
    %c0_i32_0 = arith.constant 0 : i32
    %c0_i32_1 = arith.constant 0 : i32
    return %c0_i32, %c0_i32_0 : i32, i32
  }
  func.func @transform_1(%arg0: i32, %arg1: i32) -> (i32, i32) {
    %c0_i32 = arith.constant 0 : i32
    %c0_i32_0 = arith.constant 0 : i32
    %c0_i32_1 = arith.constant 0 : i32
    return %c0_i32, %c0_i32_0 : i32, i32
  }
  func.func @transform_2(%arg0: i32, %arg1: i32) -> (i32, i32) {
    %c1_i32 = arith.constant 1 : i32
    %0 = arith.muli %arg0, %c1_i32 : i32
    %1 = arith.addi %0, %arg1 : i32
    %c0_i32 = arith.constant 0 : i32
    %c0_i32_0 = arith.constant 0 : i32
    return %1, %c0_i32 : i32, i32
  }
  func.func @transform_3(%arg0: i32, %arg1: i32) -> (i32, i32) {
    %c1_i32 = arith.constant 1 : i32
    %0 = arith.muli %arg0, %c1_i32 : i32
    %1 = arith.addi %0, %arg1 : i32
    %c0_i32 = arith.constant 0 : i32
    %c0_i32_0 = arith.constant 0 : i32
    return %1, %c0_i32 : i32, i32
  }
  func.func @transform_4(%arg0: i32, %arg1: i32) -> (i32, i32, i32) {
    %c0_i32 = arith.constant 0 : i32
    %c0_i32_0 = arith.constant 0 : i32
    %c0_i32_1 = arith.constant 0 : i32
    return %arg0, %c0_i32, %c0_i32_0 : i32, i32, i32
  }
}

</mosaic_0001>

<bundles_post_ra>
// kernel: tpu_custom_call.1
= control target key start
LH: loop header
LB: loop body
LE: loop exit
PB: predicated region body
PF: predicated region fallthrough
CT: control target
= control target key end

     0   :  { %9 = vsyncpa [#allocation4], 0  ;;  %s288_s0 = inlined_call_operand.vmem [shape: f32[2,10], index: 0, kind: input, shape index: {}]   ;;  %s289_s1 = inlined_call_operand.vmem [shape: s32[2,1], index: 1, kind: input, shape index: {}]   ;;  %s290_s2 = inlined_call_operand.hbm [shape: f32[8,256], index: 2, kind: input, shape index: {}]   ;;  %s291_s3 = inlined_call_operand.hbm [shape: f32[8,256], index: 3, kind: input, shape index: {}]   ;;  %s292_s4 = inlined_call_operand.hbm [shape: f32[1,8,128], index: 4, kind: output, shape index: {}]  }
   0x1   :  { %10 = vsyncpa [#allocation7], 0 }
   0x2   :  { %11 = vsyncpa [#allocation5], 0  ;;  %s25_s17 = sshll.u32 %s290_s2, 4  ;;  %s243_s18 = smov [#allocation3]   ;;  %s26_s17 = int_to_ptr.hbm [resolvable:$true] %s25_s17 }
   0x3   :  { %s27_s19 = sshll.u32 %s243_s18, 4  ;;  %s40_s22 = sshll.u32 %s291_s3, 4  ;;  %s28_s19 = int_to_ptr.vmem [resolvable:$true] %s27_s19  ;;  %s41_s22 = int_to_ptr.hbm [resolvable:$true] %s40_s22 }
   0x4   :  { %30 = dma.hbm_to_vmem [thread:$0]  %s26_s17, 256, %s28_s19, [#allocation4]  }
   0x5   :  { %s244_s23 = smov [#allocation6]  }
   0x6   :  { %s42_s24 = sshll.u32 %s244_s23, 4  ;;  %s43_s24 = int_to_ptr.vmem [resolvable:$true] %s42_s24 }
   0x7   :  { %45 = dma.hbm_to_vmem [thread:$0]  %s41_s22, 256, %s43_s24, [#allocation7]  }
   0x8   :  { %237 = dma.done.wait [#allocation4], 256  }
   0x9   :  { %238 = vsyncadd [#allocation4], 4294967040 }
   0xa   :  { %239 = dma.done.wait [#allocation7], 256  }
   0xb   :  { %240 = vsyncadd [#allocation7], 4294967040  ;;  %v245_v0 = vmov 0   ;;  %v94_v1 = vld [vmem:[%s289_s1] sm:$0x3]  ;;  %v63_v3 = vld [vmem:[#allocation3 + $0x8] sm:$0xff]  ;;  %v95_v12 = vlaneseq }
   0xc   :  { %164 = vset.pattern.permute.xlu0 %v245_v0  ;;  %v62_v2 = vld [vmem:[#allocation3] sm:$0xff]  ;;  %v64_v4 = vld [vmem:[#allocation6] sm:$0xff]  ;;  %v65_v5 = vld [vmem:[#allocation6 + $0x8] sm:$0xff]  ;;  %v246_v19 = vmov 0.0   ;;  %vm114_vm1 = vcmask 74752   ;;  %s247_s27 = smov [#allocation8]  }
   0xd   :  { %98 = vperm.xlu0 %164, %v94_v1   ;;  %v66_v6 = vsub.f32 %v62_v2, %v64_v4  ;;  %v67_v7 = vsub.f32 %v63_v3, %v65_v5  ;;  %v93_v11 = vld [vmem:[%s288_s0] sm:$0x3]  ;;  %v96_v15 = vand.u32 127, %v95_v12  ;;  %v127_v43 = vshrl.u32 %v95_v12, 7  ;;  %s140_s28 = sshll.u32 %s247_s27, 4  ;;  %s142_s6 = sshll.u32 %s292_s4, 4  ;;  %s141_s28 = int_to_ptr.vmem [resolvable:$true] %s140_s28  ;;  %s143_s6 = int_to_ptr.hbm [resolvable:$true] %s142_s6 }
   0xe   :  { %v103_v13 = vsub.f32 0.9, %v93_v11  ;;  %v154_v14 = vadd.f32 -0.1, %v93_v11 }
   0xf   :  { %v68_v8 = vmul.f32 %v66_v6, %v66_v6  ;;  %v69_v9 = vmul.f32 %v67_v7, %v67_v7  ;;  %vm129_vm2 = vcmp.eq.s32.totalorder %v127_v43, 1  ;;  %vm128_vm3 = vcmp.eq.s32.totalorder %v127_v43, 0 }
  0x10   :  { %v104_v16 = vmax.f32 %v103_v13, 0.0  ;;  %v107_v17 = vmax.f32 %v154_v14, 0.0 }
  0x11   :  { %v83_v10 = vadd.f32 %v69_v9, %v68_v8 }
  0x12   :  { %v105_v21 = vmul.f32 %v104_v16, %v104_v16  ;;  %v108_v23 = vmul.f32 %v107_v17, %v107_v17 }
  0x37   :  { %84 = vadd.xlane.f32.xlu0 %v83_v10 }
  0x7f   :  { %v99_v18 = vpop.permute.xlu0 %98 }
  0x80   :  { %vm100_vm0 = vcmp.eq.s32.totalorder %v96_v15, %v99_v18 }
  0x81   :  { %v153_v20 = vsel %vm100_vm0, 1.0, %v246_v19 }
  0x82   :  { %v110_v22 = vsub.f32 1.0, %v153_v20  ;;  %v109_v25 = vmul.f32 %v153_v20, %v105_v21 }
  0x84   :  { %v111_v24 = vmul.f32 0.5, %v110_v22 }
  0x86   :  { %v112_v26 = vmul.f32 %v111_v24, %v108_v23 }
  0x88   :  { %v113_v27 = vadd.f32 %v112_v26, %v109_v25 }
  0x8a   :  { %v115_v28 = vsel %vm114_vm1, %v113_v27, 0.0 }
  0x8b   :  { %116 = vadd.xlane.f32.xlu1 %v115_v28 }
  0xaa   :  { %v85_v29 = vpop.xlane.xlu0 %84 }
  0xab   :  { %v86_v30 = vrot.slane %v85_v29, 4 }
  0xad   :  { %v87_v31 = vadd.f32 %v86_v30, %v85_v29 }
  0xaf   :  { %v88_v32 = vrot.slane %v87_v31, 2 }
  0xb1   :  { %v89_v33 = vadd.f32 %v88_v32, %v87_v31 }
  0xb3   :  { %v90_v34 = vrot.slane %v89_v33, 1 }
  0xb5   :  { %v91_v35 = vadd.f32 %v90_v34, %v89_v33 }
  0xb7   :  { %155 = vpush %v91_v35 }
  0xe8   :  { %s156_s0 = spop %155 }
  0xe9   :  { %v132_v45 = vstv %s156_s0 }
  0xfe   :  { %v117_v36 = vpop.xlane.xlu1 %116 }
  0xff   :  { %v118_v37 = vrot.slane %v117_v36, 4 }
 0x101   :  { %v119_v38 = vadd.f32 %v118_v37, %v117_v36 }
 0x103   :  { %v120_v39 = vrot.slane %v119_v38, 2 }
 0x105   :  { %v121_v40 = vadd.f32 %v120_v39, %v119_v38 }
 0x107   :  { %v122_v41 = vrot.slane %v121_v40, 1 }
 0x109   :  { %v123_v42 = vadd.f32 %v122_v41, %v121_v40 }
 0x10b   :  { %157 = vpush %v123_v42 }
 0x13c   :  { %s158_s1 = spop %157 }
 0x13d   :  { %s125_s29 = smul.f32 0.5, %s158_s1 }
 0x13f   :  { %v130_v44 = vstv %s125_s29 }
 0x140   :  { %v131_v46 = vsel %vm129_vm2, %v130_v44, 0.0 }
 0x141   :  { %v133_v47 = vsel %vm128_vm3, %v132_v45, %v131_v46 }
 0x142   :  { %134 = vst [vmem:[#allocation8] sm:$0xff] %v133_v47 }
 0x143   :  { %145 = dma.vmem_to_hbm [thread:$0]  %s141_s28, 128, %s143_s6, [#allocation5]  }
 0x144   :  { %241 = dma.done.wait [#allocation5], 128  }
 0x145   :  { %242 = vsyncadd [#allocation5], 4294967168 }
 0x146   :  { %150 = vsyncpa [#allocation4], 1 }
 0x147   :  { %151 = vsyncpa [#allocation7], 1 }
 0x148   :  { %152 = vsyncpa [#allocation5], 1 }

</bundles_post_ra>
